<compile_context>
chip_gen: v5e
topology: v5e:2x2
jax: 0.10.0
libtpu: 0.0.40
codegen_flags: <defaults>
</compile_context>

<pallas_src>
import jax
import jax.numpy as jnp
from jax.experimental import pallas as pl
from jax.experimental.pallas import tpu as pltpu


def linear_pool_kernel(x_ref, p_ref, w_ref, b_ref, o_ref):
    # x_ref: (RB, H*W)     row block (batch*channel rows), spatial flat on lanes
    # p_ref: (H*W, Ho*Wo)  static 0/1 window-selection matrix (same block every step)
    # w_ref, b_ref: (RB, 1) per-row (== per-channel) affine parameters
    # o_ref: (RB, Ho*Wo)   lane-dense output block
    # 2x2 sum pooling == depthwise ones-conv with stride 2.  One MXU matmul
    # against the 0/1 selection matrix does every window sum; HIGHEST precision
    # keeps the f32 path exact (selection entries are exactly representable).
    pooled = jnp.dot(
        x_ref[...], p_ref[...],
        preferred_element_type=jnp.float32,
        precision=jax.lax.Precision.HIGHEST,
    )                                               # (RB, HoWo) f32
    y = w_ref[...] * pooled + b_ref[...]            # (RB, 1) broadcasts over lanes
    # TODO(synk): PyTorch computes Sigmoid(y) here but throws the result away,
    # so it is intentionally not applied to the output.
    o_ref[...] = y.astype(o_ref.dtype)


def _choose_row_block(R, HW, HoWo, budget_bytes=2 * 1024 * 1024):
    """Largest row chunk that (a) divides R = N*C, (b) keeps sublane tiling clean
    (multiple of 8, or the full R), and (c) keeps the f32 per-block working set
    (input + output + lane-padded w/b slabs) a small fraction of double-buffered
    scoped VMEM on all generations (16 / 32 / 32 MiB defaults v5e / v6e / v7x)."""
    candidates = [d for d in range(1, R + 1)
                  if R % d == 0 and (d == R or d % 8 == 0)]
    per_row_bytes = (HW + HoWo + 2 * 128) * 4       # w/b pad to 128 lanes in VMEM
    fitting = [d for d in candidates if d * per_row_bytes <= budget_bytes]
    return max(fitting) if fitting else min(candidates)


def linear_pool(x, w, b, *, row_block=None):
    """x: (N, C, H, W); w, b: (C, 1, 1) per-channel affine params."""
    N, C, H, W = x.shape
    assert H % 2 == 0 and W % 2 == 0
    Ho, Wo = H // 2, W // 2
    HW, HoWo = H * W, Ho * Wo
    R = N * C

    if row_block is None:
        row_block = _choose_row_block(R, HW, HoWo)
    assert R % row_block == 0
    n_rblk = R // row_block

    # Layout glue only (contiguous reshapes / tiny tiles, free):
    #   rows are ordered r = n*C + c, so tiling the (C,1) params N times along
    #   rows lines each row up with its channel's (w, b).
    x2 = x.reshape(R, HW)
    w_rows = jnp.tile(w.reshape(C, 1).astype(jnp.float32), (N, 1))   # (R, 1)
    b_rows = jnp.tile(b.reshape(C, 1).astype(jnp.float32), (N, 1))   # (R, 1)

    # Static 0/1 selection matrix for non-overlapping 2x2 windows:
    #   pool[h*W + w, ho*Wo + wo] = 1  iff  h//2 == ho and w//2 == wo
    h_idx = jnp.arange(H).reshape(H, 1, 1, 1)
    w_idx = jnp.arange(W).reshape(1, W, 1, 1)
    ho_idx = jnp.arange(Ho).reshape(1, 1, Ho, 1)
    wo_idx = jnp.arange(Wo).reshape(1, 1, 1, Wo)
    pool = ((h_idx // 2 == ho_idx) & (w_idx // 2 == wo_idx)
            ).astype(x.dtype).reshape(HW, HoWo)

    out_flat = pl.pallas_call(
        linear_pool_kernel,
        out_shape=jax.ShapeDtypeStruct((R, HoWo), x.dtype),
        grid=(n_rblk,),
        in_specs=[
            pl.BlockSpec((row_block, HW), lambda r: (r, 0)),
            pl.BlockSpec((HW, HoWo), lambda r: (0, 0)),
            pl.BlockSpec((row_block, 1), lambda r: (r, 0)),
            pl.BlockSpec((row_block, 1), lambda r: (r, 0)),
        ],
        out_specs=pl.BlockSpec((row_block, HoWo), lambda r: (r, 0)),
        compiler_params=pltpu.CompilerParams(
            dimension_semantics=("parallel",),
            vmem_limit_bytes=32 * 1024 * 1024,
        ),
    )(x2, pool, w_rows, b_rows)

    # Contiguous reshape back to the PyTorch NCHW-pooled layout (free).
    return out_flat.reshape(N, C, Ho, Wo)


if __name__ == "__main__":
    key = jax.random.PRNGKey(0)
    kx, kw, kb = jax.random.split(key, 3)

    N, C, H, W = 2, 4, 16, 16
    x = jax.random.normal(kx, (N, C, H, W), dtype=jnp.float32)
    # deterministic stand-ins for torch.randn parameters of shape (C, 1, 1)
    w = jax.random.normal(kw, (C, 1, 1), dtype=jnp.float32)
    b = jax.random.normal(kb, (C, 1, 1), dtype=jnp.float32)

    out = jax.block_until_ready(linear_pool(x, w, b))

    # pure-JAX reference (same math as the PyTorch forward)
    Ho, Wo = H // 2, W // 2
    ref_pool = x.reshape(N, C, Ho, 2, Wo, 2).sum(axis=(3, 5))
    ref = w.reshape(1, C, 1, 1) * ref_pool + b.reshape(1, C, 1, 1)

    assert out.shape == (N, C, Ho, Wo), out.shape
    assert jnp.allclose(out, ref, atol=1e-5, rtol=1e-5), "mismatch vs reference"
    print("KERNEL_OK")
</pallas_src>

<mosaic_0001>
module attributes {stable_mosaic.version = 11 : i64} {
  func.func @linear_pool_kernel(%arg0: i32, %arg1: memref<8x256xf32, #tpu.memory_space<vmem>>, %arg2: memref<256x64xf32, #tpu.memory_space<vmem>>, %arg3: memref<8x1xf32, #tpu.memory_space<vmem>>, %arg4: memref<8x1xf32, #tpu.memory_space<vmem>>, %arg5: memref<8x64xf32, #tpu.memory_space<vmem>>) attributes {dimension_semantics = [#tpu.dimension_semantics<parallel>], iteration_bounds = array<i64: 1>, scalar_prefetch = 0 : i64, scratch_operands = 0 : i64, tpu.core_type = #tpu.core_type<tc>, window_params = [{transform_indices = @transform_0, window_bounds = array<i64: 8, 256>}, {pipeline_mode = #tpu.pipeline_mode<synchronous>, transform_indices = @transform_1, window_bounds = array<i64: 256, 64>}, {transform_indices = @transform_2, window_bounds = array<i64: 8, 1>}, {transform_indices = @transform_3, window_bounds = array<i64: 8, 1>}, {transform_indices = @transform_4, window_bounds = array<i64: 8, 64>}]} {
    %c0 = arith.constant 0 : index
    %c0_0 = arith.constant 0 : index
    %0 = vector.load %arg1[%c0, %c0_0] : memref<8x256xf32, #tpu.memory_space<vmem>>, vector<8x256xf32>
    %c0_1 = arith.constant 0 : index
    %c0_2 = arith.constant 0 : index
    %1 = vector.load %arg2[%c0_1, %c0_2] : memref<256x64xf32, #tpu.memory_space<vmem>>, vector<256x64xf32>
    %cst = arith.constant dense<0.000000e+00> : vector<8x64xf32>
    %2 = tpu.matmul %0, %1, %cst {dimension_numbers = #tpu.dot_dimension_numbers<[1], [0], [0], [1], [0, 0, 1, 1], [], []>, precision = #tpu.contract_precision<fp32>} : vector<8x256xf32>, vector<256x64xf32>, vector<8x64xf32> -> vector<8x64xf32>
    %c0_3 = arith.constant 0 : index
    %c0_4 = arith.constant 0 : index
    %3 = vector.load %arg3[%c0_3, %c0_4] : memref<8x1xf32, #tpu.memory_space<vmem>>, vector<8x1xf32>
    %4 = vector.broadcast %3 : vector<8x1xf32> to vector<8x64xf32>
    %5 = arith.mulf %4, %2 : vector<8x64xf32>
    %c0_5 = arith.constant 0 : index
    %c0_6 = arith.constant 0 : index
    %6 = vector.load %arg4[%c0_5, %c0_6] : memref<8x1xf32, #tpu.memory_space<vmem>>, vector<8x1xf32>
    %7 = vector.broadcast %6 : vector<8x1xf32> to vector<8x64xf32>
    %8 = arith.addf %5, %7 : vector<8x64xf32>
    %c0_7 = arith.constant 0 : index
    %c0_8 = arith.constant 0 : index
    %9 = vector.load %arg5[%c0_7, %c0_8] : memref<8x64xf32, #tpu.memory_space<vmem>>, vector<8x64xf32>
    tpu.vector_store %arg5[%c0_7, %c0_8], %8 {strides = array<i32>} : memref<8x64xf32, #tpu.memory_space<vmem>>, vector<8x64xf32>,
    return
  }
  func.func @transform_0(%arg0: i32) -> (i32, i32) {
    %c0_i32 = arith.constant 0 : i32
    %c0_i32_0 = arith.constant 0 : i32
    return %arg0, %c0_i32 : i32, i32
  }
  func.func @transform_1(%arg0: i32) -> (i32, i32) {
    %c0_i32 = arith.constant 0 : i32
    %c0_i32_0 = arith.constant 0 : i32
    %c0_i32_1 = arith.constant 0 : i32
    return %c0_i32, %c0_i32_0 : i32, i32
  }
  func.func @transform_2(%arg0: i32) -> (i32, i32) {
    %c0_i32 = arith.constant 0 : i32
    %c0_i32_0 = arith.constant 0 : i32
    return %arg0, %c0_i32 : i32, i32
  }
  func.func @transform_3(%arg0: i32) -> (i32, i32) {
    %c0_i32 = arith.constant 0 : i32
    %c0_i32_0 = arith.constant 0 : i32
    return %arg0, %c0_i32 : i32, i32
  }
  func.func @transform_4(%arg0: i32) -> (i32, i32) {
    %c0_i32 = arith.constant 0 : i32
    %c0_i32_0 = arith.constant 0 : i32
    return %arg0, %c0_i32 : i32, i32
  }
}

</mosaic_0001>

<bundles_post_ra>
// kernel: tpu_custom_call.1
= control target key start
LH: loop header
LB: loop body
LE: loop exit
PB: predicated region body
PF: predicated region fallthrough
CT: control target
= control target key end

     0   :  { %s1439_s0 = inlined_call_operand.vmem [shape: f32[8,256], index: 0, kind: input, shape index: {}]   ;;  %s1440_s1 = inlined_call_operand.vmem [shape: f32[256,64], index: 1, kind: input, shape index: {}]   ;;  %s1441_s2 = inlined_call_operand.vmem [shape: f32[8,1], index: 2, kind: input, shape index: {}]   ;;  %s1442_s3 = inlined_call_operand.vmem [shape: f32[8,1], index: 3, kind: input, shape index: {}]   ;;  %s1443_s4 = inlined_call_operand.hbm [shape: f32[8,64], index: 4, kind: output, shape index: {}]  }
   0x1   :  { %v35_v0 = vld [vmem:[%s1440_s1 + $0x78] sm:$0xff]  ;;  %v34_v1 = vld [vmem:[%s1440_s1 + $0x70] sm:$0xff]  ;;  %v33_v2 = vld [vmem:[%s1440_s1 + $0x68] sm:$0xff] }
   0x2   :  { %v831_v3 = vand.u32 4294901760, %v35_v0  ;;  %v833_v4 = vand.u32 4294901760, %v34_v1  ;;  %v835_v5 = vand.u32 4294901760, %v33_v2  ;;  %v32_v6 = vld [vmem:[%s1440_s1 + $0x60] sm:$0xff]  ;;  %v31_v7 = vld [vmem:[%s1440_s1 + $0x58] sm:$0xff]  ;;  %v30_v8 = vld [vmem:[%s1440_s1 + $0x50] sm:$0xff] }
   0x3   :  { %v846_v9 = vand.u32 4294901760, %v32_v6  ;;  %v848_v10 = vand.u32 4294901760, %v31_v7  ;;  %v850_v11 = vand.u32 4294901760, %v30_v8  ;;  %v29_v12 = vld [vmem:[%s1440_s1 + $0x48] sm:$0xff]  ;;  %v28_v13 = vld [vmem:[%s1440_s1 + $0x40] sm:$0xff]  ;;  %v27_v18 = vld [vmem:[%s1440_s1 + $0x38] sm:$0xff] }
   0x4   :  { %53 = vmatpush.msra.mxu0 %v831_v3  ;;  %v860_v14 = vsub.f32 %v35_v0, %v831_v3  ;;  %v863_v15 = vsub.f32 %v34_v1, %v833_v4  ;;  %249 = vmatpush.msra.mxu3 %v831_v3  ;;  %v867_v16 = vsub.f32 %v33_v2, %v835_v5  ;;  %v869_v17 = vand.u32 4294901760, %v29_v12  ;;  %v26_v26 = vld [vmem:[%s1440_s1 + $0x30] sm:$0xff]  ;;  %v25_v34 = vld [vmem:[%s1440_s1 + $0x28] sm:$0xff] }
   0x5   :  { %v875_v19 = vsub.f32 %v32_v6, %v846_v9  ;;  %v878_v20 = vsub.f32 %v31_v7, %v848_v10  ;;  %v881_v21 = vsub.f32 %v30_v8, %v850_v11  ;;  %v888_v25 = vand.u32 4294901760, %v28_v13 }
   0x6   :  { %55 = vmatpush.msra.mxu0 %v833_v4  ;;  %196 = vmatpush.msra.mxu2 %v860_v14  ;;  %v95_v22 = vand.u32 4294901760, %v860_v14  ;;  %v1459_v23 = vand.u32 4294901760, %v863_v15  ;;  %v1457_v24 = vand.u32 4294901760, %v867_v16  ;;  %v895_v28 = vand.u32 4294901760, %v27_v18 }
   0x7   :  { %251 = vmatpush.msra.mxu3 %v833_v4  ;;  %v1455_v27 = vand.u32 4294901760, %v875_v19  ;;  %v898_v29 = vsub.f32 %v29_v12, %v869_v17  ;;  %v1453_v33 = vand.u32 4294901760, %v878_v20 }
   0x8   :  { %57 = vmatpush.msra.mxu0 %v835_v5  ;;  %199 = vmatpush.msra.mxu2 %v863_v15  ;;  %v96_v30 = vsub.f32 %v860_v14, %v95_v22  ;;  %v102_v31 = vsub.f32 %v863_v15, %v1459_v23  ;;  %v108_v32 = vsub.f32 %v867_v16, %v1457_v24 }
   0x9   :  { %9 = vsyncpa [#allocation3], 0  ;;  %253 = vmatpush.msra.mxu3 %v835_v5  ;;  %v916_v35 = vand.u32 4294901760, %v26_v26  ;;  %v1452_v36 = vand.u32 4294901760, %v881_v21  ;;  %v114_v39 = vsub.f32 %v875_v19, %v1455_v27  ;;  %v925_v40 = vsub.f32 %v28_v13, %v888_v25  ;;  %v24_v42 = vld [vmem:[%s1440_s1 + $0x20] sm:$0xff]  ;;  %v23_v48 = vld [vmem:[%s1440_s1 + $0x18] sm:$0xff] }
   0xa   :  { %59 = vmatpush.msra.mxu0 %v846_v9  ;;  %v97_v37 = vand.u32 4294901760, %v96_v30  ;;  %202 = vmatpush.msra.mxu2 %v867_v16  ;;  %v103_v38 = vand.u32 4294901760, %v102_v31  ;;  %v928_v41 = vand.u32 4294901760, %v25_v34  ;;  %v109_v43 = vand.u32 4294901760, %v108_v32  ;;  %v22_v54 = vld [vmem:[%s1440_s1 + $0x10] sm:$0xff]  ;;  %v51_v59 = vld [vmem:[%s1440_s1 + $0xf8] sm:$0xff] }
   0xb   :  { %255 = vmatpush.msra.mxu3 %v846_v9  ;;  %v120_v44 = vsub.f32 %v878_v20, %v1453_v33  ;;  %v1450_v45 = vand.u32 4294901760, %v898_v29  ;;  %v939_v46 = vsub.f32 %v27_v18, %v895_v28  ;;  %v126_v47 = vsub.f32 %v881_v21, %v1452_v36  ;;  %v21_v61 = vld [vmem:[%s1440_s1 + $0x8] sm:$0xff]  ;;  %v20_v2 = vld [vmem:[%s1440_s1] sm:$0xff]  ;;  %v50_v6 = vld [vmem:[%s1440_s1 + $0xf0] sm:$0xff]  ;;  %s757_s9 = sshll.u32 %s1443_s4, 4  ;;  %s758_s9 = int_to_ptr.hbm [resolvable:$true] %s757_s9 }
   0xc   :  { %61 = vmatpush.msra.mxu0 %v848_v10  ;;  %98 = vmatpush.msra.mxu1 %v97_v37  ;;  %v115_v49 = vand.u32 4294901760, %v114_v39  ;;  %v950_v50 = vand.u32 4294901760, %v24_v42  ;;  %v1449_v51 = vand.u32 4294901760, %v925_v40  ;;  %v954_v52 = vsub.f32 %v26_v26, %v916_v35  ;;  %v49_v32 = vld [vmem:[%s1440_s1 + $0xe8] sm:$0xff] }
   0xd   :  { %205 = vmatpush.msra.mxu2 %v875_v19  ;;  %257 = vmatpush.msra.mxu3 %v848_v10  ;;  %v959_v53 = vsub.f32 %v25_v34, %v928_v41  ;;  %v121_v55 = vand.u32 4294901760, %v120_v44  ;;  %v132_v56 = vsub.f32 %v898_v29, %v1450_v45  ;;  %v968_v57 = vand.u32 4294901760, %v23_v48  ;;  %v48_v44 = vld [vmem:[%s1440_s1 + $0xe0] sm:$0xff] }
   0xe   :  { %63 = vmatpush.msra.mxu0 %v850_v11  ;;  %104 = vmatpush.msra.mxu1 %v103_v38  ;;  %v1448_v58 = vand.u32 4294901760, %v939_v46  ;;  %v127_v60 = vand.u32 4294901760, %v126_v47  ;;  %v138_v62 = vsub.f32 %v925_v40, %v1449_v51  ;;  %v983_v63 = vand.u32 4294901760, %v22_v54  ;;  %v44_v45 = vld [vmem:[%s1440_s1 + $0xc0] sm:$0xff] }
   0xf   :  { %208 = vmatpush.msra.mxu2 %v878_v20  ;;  %259 = vmatpush.msra.mxu3 %v850_v11  ;;  %v1446_v0 = vand.u32 4294901760, %v954_v52  ;;  %v987_v1 = vsub.f32 %v24_v42, %v950_v50  ;;  %v1445_v7 = vand.u32 4294901760, %v959_v53  ;;  %v998_v8 = vand.u32 4294901760, %v51_v59 }
  0x10   :  { %65 = vmatpush.msra.mxu0 %v869_v17  ;;  %110 = vmatpush.msra.mxu1 %v109_v43  ;;  %v133_v12 = vand.u32 4294901760, %v132_v56  ;;  %v144_v13 = vsub.f32 %v939_v46, %v1448_v58  ;;  %v1004_v18 = vand.u32 4294901760, %v21_v61  ;;  %v1007_v26 = vsub.f32 %v23_v48, %v968_v57 }
  0x11   :  { %211 = vmatpush.msra.mxu2 %v881_v21  ;;  %261 = vmatpush.msra.mxu3 %v869_v17  ;;  %v1011_v30 = vand.u32 4294901760, %v20_v2  ;;  %v1013_v31 = vand.u32 4294901760, %v50_v6  ;;  %v139_v34 = vand.u32 4294901760, %v138_v62  ;;  %v150_v37 = vsub.f32 %v954_v52, %v1446_v0 }
  0x12   :  { %67 = vmatpush.msra.mxu0 %v888_v25  ;;  %116 = vmatpush.msra.mxu1 %v115_v49  ;;  %v1444_v38 = vand.u32 4294901760, %v987_v1  ;;  %v1024_v39 = vsub.f32 %v22_v54, %v983_v63  ;;  %v156_v42 = vsub.f32 %v959_v53, %v1445_v7  ;;  %v1032_v43 = vsub.f32 %v51_v59, %v998_v8  ;;  %v47_v59 = vld [vmem:[%s1440_s1 + $0xd8] sm:$0xff]  ;;  %v45_v7 = vld [vmem:[%s1440_s1 + $0xc8] sm:$0xff] }
  0x13   :  { %214 = vmatpush.msra.mxu2 %v898_v29  ;;  %263 = vmatpush.msra.mxu3 %v888_v25  ;;  %v145_v47 = vand.u32 4294901760, %v144_v13  ;;  %v1447_v48 = vand.u32 4294901760, %v1007_v26  ;;  %v1040_v49 = vsub.f32 %v21_v61, %v1004_v18  ;;  %v1042_v54 = vand.u32 4294901760, %v49_v32  ;;  %v46_v13 = vld [vmem:[%s1440_s1 + $0xd0] sm:$0xff] }
  0x14   :  { %69 = vmatpush.msra.mxu0 %v895_v28  ;;  %122 = vmatpush.msra.mxu1 %v121_v55  ;;  %v1047_v55 = vsub.f32 %v20_v2, %v1011_v30  ;;  %v1050_v56 = vsub.f32 %v50_v6, %v1013_v31  ;;  %v162_v61 = vsub.f32 %v987_v1, %v1444_v38  ;;  %v1451_v62 = vand.u32 4294901760, %v1024_v39 }
  0x15   :  { %217 = vmatpush.msra.mxu2 %v925_v40  ;;  %265 = vmatpush.msra.mxu3 %v895_v28  ;;  %v157_v2 = vand.u32 4294901760, %v156_v42  ;;  %v1454_v6 = vand.u32 4294901760, %v1032_v43  ;;  %v1074_v38 = vsub.f32 %v49_v32, %v1042_v54  ;;  %v1076_v42 = vand.u32 4294901760, %v47_v59 }
  0x16   :  { %71 = vmatpush.msra.mxu0 %v916_v35  ;;  %128 = vmatpush.msra.mxu1 %v127_v60  ;;  %v151_v60 = vand.u32 4294901760, %v150_v37  ;;  %v1456_v37 = vand.u32 4294901760, %v1040_v49  ;;  %v1458_v0 = vand.u32 4294901760, %v1050_v56  ;;  %v174_v32 = vsub.f32 %v1024_v39, %v1451_v62 }
  0x17   :  { %220 = vmatpush.msra.mxu2 %v939_v46  ;;  %267 = vmatpush.msra.mxu3 %v916_v35  ;;  %v1092_v51 = vand.u32 4294901760, %v46_v13  ;;  %v1461_v36 = vand.u32 4294901760, %v1074_v38  ;;  %v1110_v33 = vsub.f32 %v47_v59, %v1076_v42  ;;  %v1117_v27 = vand.u32 4294901760, %v44_v45 }
  0x18   :  { %73 = vmatpush.msra.mxu0 %v928_v41  ;;  %134 = vmatpush.msra.mxu1 %v133_v12  ;;  %v1060_v12 = vand.u32 4294901760, %v48_v44  ;;  %v180_v62 = vsub.f32 %v1040_v49, %v1456_v37  ;;  %vm748_vm0 = vcmask 523264  }
  0x19   :  { %223 = vmatpush.msra.mxu2 %v954_v52  ;;  %269 = vmatpush.msra.mxu3 %v928_v41  ;;  %v1128_v24 = vsub.f32 %v46_v13, %v1092_v51  ;;  %v449_v13 = vsub.f32 %v1074_v38, %v1461_v36  ;;  %v1463_v14 = vand.u32 4294901760, %v1110_v33 }
  0x1a   :  { %75 = vmatpush.msra.mxu0 %v950_v50  ;;  %140 = vmatpush.msra.mxu1 %v139_v34  ;;  %v168_v34 = vsub.f32 %v1007_v26, %v1447_v48  ;;  %v163_v48 = vand.u32 4294901760, %v162_v61  ;;  %v1090_v58 = vsub.f32 %v48_v44, %v1060_v12  ;;  %v1102_v61 = vand.u32 4294901760, %v45_v7 }
  0x1b   :  { %226 = vmatpush.msra.mxu2 %v959_v53  ;;  %271 = vmatpush.msra.mxu3 %v950_v50 }
  0x1c   :  { %77 = vmatpush.msra.mxu0 %v968_v57  ;;  %146 = vmatpush.msra.mxu1 %v145_v47  ;;  %v1460_v47 = vand.u32 4294901760, %v1047_v55  ;;  %v169_v44 = vand.u32 4294901760, %v168_v34  ;;  %v175_v34 = vand.u32 4294901760, %v174_v32  ;;  %v1462_v37 = vand.u32 4294901760, %v1090_v58 }
  0x1d   :  { %229 = vmatpush.msra.mxu2 %v987_v1  ;;  %273 = vmatpush.msra.mxu3 %v968_v57  ;;  %v1134_v23 = vsub.f32 %v45_v7, %v1102_v61  ;;  %v181_v32 = vand.u32 4294901760, %v180_v62  ;;  %v41_v62 = vld [vmem:[%s1440_s1 + $0xa8] sm:$0xff] }
  0x1e   :  { %79 = vmatpush.msra.mxu0 %v983_v63  ;;  %152 = vmatpush.msra.mxu1 %v151_v60  ;;  %v437_v60 = vsub.f32 %v1032_v43, %v1454_v6  ;;  %v443_v6 = vsub.f32 %v1050_v56, %v1458_v0  ;;  %v186_v59 = vsub.f32 %v1047_v55, %v1460_v47 }
  0x1f   :  { %232 = vmatpush.msra.mxu2 %v1007_v26  ;;  %275 = vmatpush.msra.mxu3 %v983_v63  ;;  %v1150_v47 = vsub.f32 %v44_v45, %v1117_v27  ;;  %v455_v36 = vsub.f32 %v1090_v58, %v1462_v37  ;;  %v461_v37 = vsub.f32 %v1110_v33, %v1463_v14  ;;  %v1467_v14 = vand.u32 4294901760, %v1128_v24 }
  0x20   :  { %81 = vmatpush.msra.mxu0 %v1004_v18  ;;  %158 = vmatpush.msra.mxu1 %v157_v2  ;;  %v43_v2 = vld [vmem:[%s1440_s1 + $0xb8] sm:$0xff]  ;;  %v438_v0 = vand.u32 4294901760, %v437_v60  ;;  %v1464_v60 = vand.u32 4294901760, %v863_v15  ;;  %v444_v7 = vand.u32 4294901760, %v443_v6  ;;  %v1465_v6 = vand.u32 4294901760, %v867_v16 }
  0x21   :  { %235 = vmatpush.msra.mxu2 %v1024_v39  ;;  %277 = vmatpush.msra.mxu3 %v1004_v18  ;;  %v1175_v16 = vand.u32 4294901760, %v41_v62 }
  0x22   :  { %83 = vmatpush.msra.mxu0 %v1011_v30  ;;  %164 = vmatpush.msra.mxu1 %v163_v48  ;;  %v42_v48 = vld [vmem:[%s1440_s1 + $0xb0] sm:$0xff] }
  0x23   :  { %238 = vmatpush.msra.mxu2 %v1040_v49  ;;  %279 = vmatpush.msra.mxu3 %v1011_v30 }
  0x24   :  { %290 = vmatpush.msrb.mxu0 %v95_v22  ;;  %170 = vmatpush.msra.mxu1 %v169_v44  ;;  %v1144_v22 = vand.u32 4294901760, %v43_v2  ;;  %v187_v44 = vand.u32 4294901760, %v186_v59  ;;  %v450_v59 = vand.u32 4294901760, %v449_v13  ;;  %v456_v13 = vand.u32 4294901760, %v455_v36  ;;  %v18_v36 = vld [vmem:[%s1439_s0] sm:$0xff] }
  0x25   :  { %241 = vmatpush.msra.mxu2 %v1047_v55  ;;  %439 = vmatpush.msrb.mxu3 %v438_v0  ;;  %v1466_v0 = vand.u32 4294901760, %v875_v19 }
  0x26   :  { %294 = vmatpush.msrb.mxu0 %v1464_v60  ;;  %176 = vmatpush.msra.mxu1 %v175_v34  ;;  %v1160_v60 = vand.u32 4294901760, %v42_v48  ;;  %v40_v34 = vld [vmem:[%s1440_s1 + $0xa0] sm:$0xff]  ;;  %v1173_v15 = vsub.f32 %v43_v2, %v1144_v22  ;;  %v467_v2 = vsub.f32 %v1128_v24, %v1467_v14 }
  0x27   :  { %394 = vmatpush.msrb.mxu2 %v998_v8  ;;  %445 = vmatpush.msrb.mxu3 %v444_v7  ;;  %v1190_v19 = vand.u32 4294901760, %v40_v34  ;;  %v1468_v7 = vand.u32 4294901760, %v878_v20 }
  0x28   :  { %298 = vmatpush.msrb.mxu0 %v1465_v6  ;;  %182 = vmatpush.msra.mxu1 %v181_v32  ;;  %v39_v32 = vld [vmem:[%s1440_s1 + $0x98] sm:$0xff]  ;;  %v1188_v45 = vsub.f32 %v42_v48, %v1160_v60  ;;  %v462_v48 = vand.u32 4294901760, %v461_v37  ;;  %v1204_v6 = vsub.f32 %v41_v62, %v1175_v16  ;;  %v38_v37 = vld [vmem:[%s1440_s1 + $0x90] sm:$0xff]  ;;  %v468_v62 = vand.u32 4294901760, %v467_v2 }
  0x29   :  { %396 = vmatpush.msrb.mxu2 %v1013_v31  ;;  %451 = vmatpush.msrb.mxu3 %v450_v59  ;;  %v1206_v20 = vand.u32 4294901760, %v39_v32  ;;  %v1220_v14 = vsub.f32 %v40_v34, %v1190_v19  ;;  %v1235_v59 = vand.u32 4294901760, %v38_v37 }
  0x2a   :  { %302 = vmatpush.msrb.mxu0 %v1466_v0  ;;  %188 = vmatpush.msra.mxu1 %v187_v44  ;;  %v1469_v0 = vand.u32 4294901760, %v1134_v23 }
  0x2b   :  { %398 = vmatpush.msrb.mxu2 %v1042_v54  ;;  %457 = vmatpush.msrb.mxu3 %v456_v13  ;;  %v1473_v13 = vand.u32 4294901760, %v1173_v15 }
  0x2c   :  { %306 = vmatpush.msrb.mxu0 %v1468_v7  ;;  %357 = vmatpush.msrb.mxu1 %v831_v3  ;;  %v473_v44 = vsub.f32 %v1134_v23, %v1469_v0  ;;  %v1470_v3 = vand.u32 4294901760, %v881_v21  ;;  %v1471_v7 = vand.u32 4294901760, %v1150_v47  ;;  %v1222_v21 = vand.u32 4294901760, %v18_v36 }
  0x2d   :  { %400 = vmatpush.msrb.mxu2 %v1060_v12  ;;  %463 = vmatpush.msrb.mxu3 %v462_v48  ;;  %v485_v34 = vsub.f32 %v1173_v15, %v1473_v13  ;;  %v1475_v48 = vand.u32 4294901760, %v1188_v45  ;;  %v1478_v13 = vand.u32 4294901760, %v954_v52  ;;  %v1480_v52 = vand.u32 4294901760, %v959_v53 }
  0x2e   :  { %310 = vmatpush.msrb.mxu0 %v1470_v3  ;;  %359 = vmatpush.msrb.mxu1 %v833_v4  ;;  %v479_v0 = vsub.f32 %v1150_v47, %v1471_v7  ;;  %v1472_v4 = vand.u32 4294901760, %v898_v29  ;;  %v474_v3 = vand.u32 4294901760, %v473_v44  ;;  %v37_v7 = vld [vmem:[%s1440_s1 + $0x88] sm:$0xff]  ;;  %v1238_v29 = vsub.f32 %v39_v32, %v1206_v20 }
  0x2f   :  { %402 = vmatpush.msrb.mxu2 %v1076_v42  ;;  %469 = vmatpush.msrb.mxu3 %v468_v62  ;;  %v1249_v2 = vsub.f32 %v18_v36, %v1222_v21  ;;  %v1251_v32 = vand.u32 4294901760, %v37_v7  ;;  %v1477_v62 = vand.u32 4294901760, %v1204_v6 }
  0x30   :  { %314 = vmatpush.msrb.mxu0 %v1472_v4  ;;  %361 = vmatpush.msrb.mxu1 %v835_v5  ;;  %v1474_v5 = vand.u32 4294901760, %v925_v40  ;;  %v480_v44 = vand.u32 4294901760, %v479_v0  ;;  %v491_v4 = vsub.f32 %v1188_v45, %v1475_v48  ;;  %v36_v40 = vld [vmem:[%s1440_s1 + $0x80] sm:$0xff]  ;;  %v486_v0 = vand.u32 4294901760, %v485_v34 }
  0x31   :  { %404 = vmatpush.msrb.mxu2 %v1092_v51  ;;  %475 = vmatpush.msrb.mxu3 %v474_v3  ;;  %v497_v36 = vsub.f32 %v1204_v6, %v1477_v62  ;;  %v1265_v48 = vsub.f32 %v38_v37, %v1235_v59  ;;  %v1479_v3 = vand.u32 4294901760, %v1220_v14  ;;  %v1278_v37 = vsub.f32 %v37_v7, %v1251_v32 }
  0x32   :  { %318 = vmatpush.msrb.mxu0 %v1474_v5  ;;  %363 = vmatpush.msrb.mxu1 %v846_v9  ;;  %v1476_v9 = vand.u32 4294901760, %v939_v46  ;;  %v508_v5 = vand.u32 4294901760, %v1238_v29  ;;  %v1270_v46 = vand.u32 4294901760, %v36_v40 }
  0x33   :  { %406 = vmatpush.msrb.mxu2 %v1102_v61  ;;  %481 = vmatpush.msrb.mxu3 %v480_v44  ;;  %v503_v34 = vsub.f32 %v1220_v14, %v1479_v3  ;;  %v498_v44 = vand.u32 4294901760, %v497_v36  ;;  %v514_v7 = vand.u32 4294901760, %v1265_v48  ;;  %v520_v62 = vand.u32 4294901760, %v1278_v37 }
  0x34   :  { %322 = vmatpush.msrb.mxu0 %v1476_v9  ;;  %365 = vmatpush.msrb.mxu1 %v848_v10  ;;  %v492_v10 = vand.u32 4294901760, %v491_v4  ;;  %v86_v9 = vand.u32 4294901760, %v1249_v2  ;;  %v509_v4 = vsub.f32 %v1238_v29, %v508_v5  ;;  %v1482_v3 = vand.u32 4294901760, %v1007_v26 }
  0x35   :  { %408 = vmatpush.msrb.mxu2 %v1117_v27  ;;  %487 = vmatpush.msrb.mxu3 %v486_v0  ;;  %v504_v53 = vand.u32 4294901760, %v503_v34 }
  0x36   :  { %326 = vmatpush.msrb.mxu0 %v1478_v13  ;;  %367 = vmatpush.msrb.mxu1 %v850_v11  ;;  %v19_v11 = vld [vmem:[%s1439_s0 + $0x8] sm:$0xff]  ;;  %v1481_v13 = vand.u32 4294901760, %v987_v1  ;;  %v87_v0 = vsub.f32 %v1249_v2, %v86_v9  ;;  %v515_v1 = vsub.f32 %v1265_v48, %v514_v7 }
  0x37   :  { %410 = vmatpush.msrb.mxu2 %v1144_v22  ;;  %493 = vmatpush.msrb.mxu3 %v492_v10  ;;  %v1300_v36 = vand.u32 4294901760, %v19_v11 }
  0x38   :  { %330 = vmatpush.msrb.mxu0 %v1480_v52  ;;  %369 = vmatpush.msrb.mxu1 %v869_v17  ;;  %v1295_v17 = vsub.f32 %v36_v40, %v1270_v46  ;;  %v1483_v40 = vand.u32 4294901760, %v1024_v39  ;;  %v88_v26 = vand.u32 4294901760, %v87_v0  ;;  %v1484_v52 = vand.u32 4294901760, %v1040_v49 }
  0x39   :  { %412 = vmatpush.msrb.mxu2 %v1160_v60  ;;  %499 = vmatpush.msrb.mxu3 %v498_v44  ;;  %v1318_v34 = vsub.f32 %v19_v11, %v1300_v36  ;;  %v1485_v39 = vand.u32 4294901760, %v1047_v55 }
  0x3a   :  { %334 = vmatpush.msrb.mxu0 %v1481_v13  ;;  %371 = vmatpush.msrb.mxu1 %v888_v25  ;;  %v510_v25 = vand.u32 4294901760, %v509_v4  ;;  %v526_v10 = vand.u32 4294901760, %v1295_v17 }
  0x3b   :  { %414 = vmatpush.msrb.mxu2 %v1175_v16  ;;  %505 = vmatpush.msrb.mxu3 %v504_v53  ;;  %v427_v11 = vand.u32 4294901760, %v1318_v34 }
  0x3c   :  { %338 = vmatpush.msrb.mxu0 %v1482_v3  ;;  %373 = vmatpush.msrb.mxu1 %v895_v28  ;;  %v521_v28 = vsub.f32 %v1278_v37, %v520_v62  ;;  %v527_v44 = vsub.f32 %v1295_v17, %v526_v10 }
  0x3d   :  { %416 = vmatpush.msrb.mxu2 %v1190_v19  ;;  %511 = vmatpush.msrb.mxu3 %v510_v25 }
  0x3e   :  { %342 = vmatpush.msrb.mxu0 %v1483_v40  ;;  %375 = vmatpush.msrb.mxu1 %v916_v35  ;;  %v516_v35 = vand.u32 4294901760, %v515_v1  ;;  %v522_v49 = vand.u32 4294901760, %v521_v28 }
  0x3f   :  { %418 = vmatpush.msrb.mxu2 %v1206_v20  ;;  %89 = vmatmul.f32.vlgmr.msra.gmra.mxu0 %v88_v26 }
  0x40   :  { %346 = vmatpush.msrb.mxu0 %v1484_v52  ;;  %377 = vmatpush.msrb.mxu1 %v928_v41  ;;  %v528_v41 = vand.u32 4294901760, %v527_v44 }
  0x41   :  { %420 = vmatpush.msrb.mxu2 %v1235_v59  ;;  %517 = vmatpush.msrb.mxu3 %v516_v35 }
  0x42   :  { %350 = vmatpush.msrb.mxu0 %v1485_v39  ;;  %379 = vmatpush.msrb.mxu1 %v950_v50  ;;  %v428_v50 = vsub.f32 %v1318_v34, %v427_v11 }
  0x43   :  { %422 = vmatpush.msrb.mxu2 %v1251_v32  ;;  %523 = vmatpush.msrb.mxu3 %v522_v49 }
  0x44   :  { %537 = vmatpush.msra.mxu0 %v1032_v43  ;;  %381 = vmatpush.msrb.mxu1 %v968_v57  ;;  %v1486_v57 = vand.u32 4294901760, %v1032_v43  ;;  %v429_v55 = vand.u32 4294901760, %v428_v50  ;;  %v1488_v43 = vand.u32 4294901760, %v1074_v38 }
  0x45   :  { %244 = vmatmul.f32.vlgmr.msra.gmra.mxu2 %v1249_v2  ;;  %283 = vmatmul.f32.vlgmr.msra.gmra.mxu3 %v86_v9 }
  0x46   :  { %540 = vmatpush.msra.mxu0 %v1050_v56  ;;  %383 = vmatpush.msrb.mxu1 %v983_v63  ;;  %v1487_v63 = vand.u32 4294901760, %v1050_v56 }
  0x47   :  { %424 = vmatpush.msrb.mxu2 %v1270_v46  ;;  %529 = vmatpush.msrb.mxu3 %v528_v41 }
  0x48   :  { %543 = vmatpush.msra.mxu0 %v1074_v38  ;;  %385 = vmatpush.msrb.mxu1 %v1004_v18  ;;  %v1489_v18 = vand.u32 4294901760, %v1090_v58  ;;  %v734_v38 = vld [vmem:[%s1441_s2] sm:$0xff] }
  0x49   :  { %631 = vmatpush.msra.mxu2 %v1486_v57  ;;  %190 = vmatmul.f32.vlgmr.msra.gmra.mxu1 %v1222_v21 }
  0x4a   :  { %546 = vmatpush.msra.mxu0 %v1090_v58  ;;  %698 = vmatpush.msra.mxu3 %v998_v8  ;;  %v1491_v58 = vand.u32 4294901760, %v1128_v24 }
  0x4b   :  { %635 = vmatpush.msra.mxu2 %v1487_v63  ;;  %387 = vmatpush.msrb.mxu1 %v1011_v30  ;;  %v1493_v30 = vand.u32 4294901760, %v1150_v47 }
  0x4c   :  { %549 = vmatpush.msra.mxu0 %v1110_v33  ;;  %700 = vmatpush.msra.mxu3 %v1013_v31 }
  0x4d   :  { %590 = vmatpush.msra.mxu1 %v998_v8  ;;  %639 = vmatpush.msra.mxu2 %v1488_v43  ;;  %v1490_v8 = vand.u32 4294901760, %v1110_v33  ;;  %v1492_v33 = vand.u32 4294901760, %v1134_v23 }
  0x4e   :  { %430 = vmatmul.f32.vlgmr.msrb.gmra.mxu2 %v429_v55  ;;  %552 = vmatpush.msra.mxu0 %v1128_v24  ;;  %v1494_v24 = vand.u32 4294901760, %v1173_v15 }
  0x4f   :  { %592 = vmatpush.msra.mxu1 %v1013_v31  ;;  %643 = vmatpush.msra.mxu2 %v1489_v18  ;;  %v795_v31 = vmov 0  }
  0x50   :  { %702 = vmatpush.msra.mxu3 %v1042_v54  ;;  %352 = vmatmul.f32.vlgmr.msrb.gmra.mxu0 %v1222_v21 }
  0x51   :  { %531 = vmatmul.f32.vlgmr.msrb.gmra.mxu3 %v1300_v36  ;;  %555 = vmatpush.msra.mxu0 %v1134_v23  ;;  %v1495_v23 = vand.u32 4294901760, %v1188_v45 }
  0x52   :  { %594 = vmatpush.msra.mxu1 %v1042_v54  ;;  %647 = vmatpush.msra.mxu2 %v1490_v8  ;;  %v741_v54 = vld [vmem:[%s1442_s3] sm:$0xff]  ;;  %s796_s3 = smov [#allocation2]  }
  0x53   :  { %704 = vmatpush.msra.mxu3 %v1060_v12  ;;  %389 = vmatmul.f32.vlgmr.msrb.gmra.mxu1 %v1222_v21  ;;  %s755_s6 = sshll.u32 %s796_s3, 4  ;;  %s756_s6 = int_to_ptr.vmem [resolvable:$true] %s755_s6 }
  0x54   :  { %558 = vmatpush.msra.mxu0 %v1150_v47  ;;  %596 = vmatpush.msra.mxu1 %v1060_v12 }
  0x55   :  { %651 = vmatpush.msra.mxu2 %v1491_v58  ;;  %706 = vmatpush.msra.mxu3 %v1076_v42 }
  0x56   :  { %561 = vmatpush.msra.mxu0 %v1173_v15  ;;  %598 = vmatpush.msra.mxu1 %v1076_v42 }
  0x57   :  { %655 = vmatpush.msra.mxu2 %v1492_v33  ;;  %708 = vmatpush.msra.mxu3 %v1092_v51 }
  0x58   :  { %564 = vmatpush.msra.mxu0 %v1188_v45  ;;  %600 = vmatpush.msra.mxu1 %v1092_v51  ;;  %v1496_v51 = vand.u32 4294901760, %v1204_v6 }
  0x59   :  { %659 = vmatpush.msra.mxu2 %v1493_v30  ;;  %710 = vmatpush.msra.mxu3 %v1102_v61 }
  0x5a   :  { %567 = vmatpush.msra.mxu0 %v1204_v6  ;;  %602 = vmatpush.msra.mxu1 %v1102_v61 }
  0x5b   :  { %663 = vmatpush.msra.mxu2 %v1494_v24  ;;  %712 = vmatpush.msra.mxu3 %v1117_v27 }
  0x5c   :  { %570 = vmatpush.msra.mxu0 %v1220_v14  ;;  %604 = vmatpush.msra.mxu1 %v1117_v27  ;;  %v1497_v27 = vand.u32 4294901760, %v1220_v14 }
  0x5d   :  { %667 = vmatpush.msra.mxu2 %v1495_v23  ;;  %714 = vmatpush.msra.mxu3 %v1144_v22 }
  0x5e   :  { %573 = vmatpush.msra.mxu0 %v1238_v29  ;;  %606 = vmatpush.msra.mxu1 %v1144_v22 }
  0x5f   :  { %671 = vmatpush.msra.mxu2 %v1496_v51  ;;  %716 = vmatpush.msra.mxu3 %v1160_v60 }
  0x60   :  { %576 = vmatpush.msra.mxu0 %v1265_v48  ;;  %608 = vmatpush.msra.mxu1 %v1160_v60 }
  0x61   :  { %675 = vmatpush.msra.mxu2 %v1497_v27  ;;  %718 = vmatpush.msra.mxu3 %v1175_v16 }
  0x62   :  { %579 = vmatpush.msra.mxu0 %v1278_v37  ;;  %610 = vmatpush.msra.mxu1 %v1175_v16 }
  0x63   :  { %679 = vmatpush.msra.mxu2 %v508_v5  ;;  %720 = vmatpush.msra.mxu3 %v1190_v19 }
  0x64   :  { %582 = vmatpush.msra.mxu0 %v1295_v17  ;;  %612 = vmatpush.msra.mxu1 %v1190_v19 }
  0x65   :  { %683 = vmatpush.msra.mxu2 %v514_v7  ;;  %722 = vmatpush.msra.mxu3 %v1206_v20 }
  0x66   :  { %585 = vmatmul.f32.vlgmr.msra.gmra.mxu0 %v1318_v34  ;;  %614 = vmatpush.msra.mxu1 %v1206_v20 }
  0x67   :  { %687 = vmatpush.msra.mxu2 %v520_v62  ;;  %724 = vmatpush.msra.mxu3 %v1235_v59 }
  0x68   :  { %616 = vmatpush.msra.mxu1 %v1235_v59  ;;  %768 = vset.pattern.permute.xlu0 %v795_v31 }
  0x69   :  { %691 = vmatpush.msra.mxu2 %v526_v10  ;;  %726 = vmatpush.msra.mxu3 %v1251_v32 }
  0x6a   :  { %693 = vmatmul.f32.vlgmr.msra.gmra.mxu2 %v1300_v36  ;;  %618 = vmatpush.msra.mxu1 %v1251_v32 }
  0x6b   :  { %728 = vmatpush.msra.mxu3 %v1270_v46  ;;  %737 = vperm.xlu0 %768, %v734_v38  }
  0x6c   :  { %730 = vmatmul.f32.vlgmr.msra.gmra.mxu3 %v1300_v36  ;;  %620 = vmatpush.msra.mxu1 %v1270_v46 }
  0x6d   :  { %624 = vmatmul.f32.vlgmr.msra.gmra.mxu1 %v427_v11 }
  0x73   :  { %744 = vperm.xlu0 %768, %v741_v54  }
  0xbc   :  { %v90_v12 = vpop.f32.mrf.mxu0 }
  0xc6   :  { %v191_v56 = vpop.f32.mrf.mxu1 }
  0xc7   :  { %v192_v42 = vadd.f32 %v191_v56, %v90_v12 }
  0xc8   :  { %v245_v47 = vpop.f32.mrf.mxu2  ;;  %v284_v22 = vpop.f32.mrf.mxu3 }
  0xc9   :  { %v246_v61 = vadd.f32 %v245_v47, %v192_v42 }
  0xcb   :  { %v285_v15 = vadd.f32 %v284_v22, %v246_v61 }
  0xcd   :  { %v353_v60 = vpop.f32.mrf.mxu0 }
  0xce   :  { %v354_v45 = vadd.f32 %v353_v60, %v285_v15 }
  0xd0   :  { %v390_v16 = vpop.f32.mrf.mxu1 }
  0xd1   :  { %v391_v6 = vadd.f32 %v390_v16, %v354_v45  ;;  %v431_v19 = vpop.f32.mrf.mxu2 }
  0xd3   :  { %v432_v14 = vadd.f32 %v431_v19, %v391_v6 }
  0xd4   :  { %v532_v20 = vpop.f32.mrf.mxu3 }
  0xd5   :  { %v533_v21 = vadd.f32 %v532_v20, %v432_v14 }
  0xdd   :  { %v738_v2 = vpop.permute.xlu0 %737 }
  0xe3   :  { %v586_v59 = vpop.f32.mrf.mxu0 }
  0xe4   :  { %v587_v29 = vadd.f32 %v586_v59, %v533_v21 }
  0xe5   :  { %v745_v7 = vpop.permute.xlu0 %744 }
  0xea   :  { %v625_v32 = vpop.f32.mrf.mxu1 }
  0xeb   :  { %v626_v5 = vadd.f32 %v625_v32, %v587_v29 }
  0xed   :  { %v694_v48 = vpop.f32.mrf.mxu2 }
  0xee   :  { %v695_v46 = vadd.f32 %v694_v48, %v626_v5 }
  0xef   :  { %v731_v9 = vpop.f32.mrf.mxu3 }
  0xf0   :  { %v732_v37 = vadd.f32 %v731_v9, %v695_v46 }
  0xf2   :  { %v740_v4 = vmul.f32 %v738_v2, %v732_v37 }
  0xf4   :  { %v747_v13 = vadd.f32 %v745_v7, %v740_v4 }
  0xf6   :  { %749 = vst.msk [vmem:[#allocation2] sm:$0xff] %vm748_vm0, %v747_v13 }
  0xf7   :  { %760 = dma.vmem_to_hbm [thread:$0]  %s756_s6, 128, %s758_s9, [#allocation3]  }
  0xf8   :  { %793 = dma.done.wait [#allocation3], 128  }
  0xf9   :  { %794 = vsyncadd [#allocation3], 4294967168 }
  0xfa   :  { %765 = vsyncpa [#allocation3], 1 }

</bundles_post_ra>
